<compile_context>
chip_gen: v7x
topology: tpu7x:2x2x1
jax: 0.10.0
libtpu: 0.0.40
codegen_flags: <defaults>
</compile_context>

<pallas_src>
import math
import jax
import jax.numpy as jnp
from jax.experimental import pallas as pl
from jax.experimental.pallas import tpu as pltpu

LN_EPS = 1e-5
BN_EPS = 1e-5
NEG_INF = -1e9          # finite key-padding mask value (avoids all-(-inf) softmax NaNs)

# MXU operands are cast to bf16 (f32 accumulate).  Set to jnp.float32 (before calling
# init_params) for an all-f32 matmul path.
MXU_DTYPE = jnp.bfloat16


def _derive_vmem_limit(frac=0.75, cap_bytes=100 * 2**20):
    """Per-generation scoped-VMEM budget: ~75% of physical VMEM (48 MiB on v7x,
    ~96 MiB on v5e/v6e), clamped; None -> platform default if the query fails."""
    try:
        info = pltpu.get_tpu_info()
        vmem = getattr(info, "vmem_capacity_bytes", None)
        if vmem:
            return int(min(vmem * frac, cap_bytes))
    except Exception:
        pass
    return None


VMEM_LIMIT_BYTES = _derive_vmem_limit()


def _cparams(*semantics):
    kw = {}
    if VMEM_LIMIT_BYTES is not None:
        kw["vmem_limit_bytes"] = VMEM_LIMIT_BYTES
    return pltpu.CompilerParams(dimension_semantics=tuple(semantics), **kw)


def _const_spec(a):
    """Whole-array block, same block at every grid step (weights / biases)."""
    return pl.BlockSpec(a.shape, lambda *_, nd=a.ndim: (0,) * nd)


def _vmem_budget():
    return VMEM_LIMIT_BYTES if VMEM_LIMIT_BYTES is not None else 32 * 2**20


def _row_cap(bytes_per_row, lo=256, hi=2048):
    """Row cap per pipelined grid step derived from the VMEM budget (double-buffered
    in/out blocks ~ 4 copies of the per-row working set)."""
    cap = (_vmem_budget() // 4) // max(bytes_per_row, 1)
    return int(max(lo, min(hi, cap)))


def _row_tile(n, cap):
    """Largest multiple-of-8 divisor of n that is <= cap."""
    cap = max(8, min(cap, n))
    for tt in range(cap // 8 * 8, 7, -8):
        if n % tt == 0:
            return tt
    # TODO(synk): for awkward n, switch to a cdiv grid with a masked last tile (or pad
    # in the wrapper) instead of falling back to the whole dimension.
    return n


def _kv_tile(T, cap=512):
    """KV tile: must be a multiple of 128 (mask last dim) or the full T."""
    if T <= cap:
        return T
    for tk in range(min(cap, T) // 128 * 128, 127, -128):
        if T % tk == 0:
            return tk
    return T


def _layer_norm(x, g, b):
    mu = jnp.mean(x, axis=-1, keepdims=True)
    var = jnp.mean((x - mu) ** 2, axis=-1, keepdims=True)
    return (x - mu) * jax.lax.rsqrt(var + LN_EPS) * g + b


def _silu(x):
    return x * jax.nn.sigmoid(x)


def _mxu(x):
    return x.astype(MXU_DTYPE)


def _ffn_rows(x, g, b, w1, b1, w2, b2):
    """Position-wise FFN on a (rows, D) slab: 0.5 * Lin2(SiLU(Lin1(LN(x)))) + x."""
    xn = _layer_norm(x, g, b)
    h = jnp.dot(_mxu(xn), w1, preferred_element_type=jnp.float32) + b1
    h = _silu(h)
    y = jnp.dot(_mxu(h), w2, preferred_element_type=jnp.float32) + b2
    return y * 0.5 + x


# --------------------------------- FFN blocks ---------------------------------

def ffn1_block(x_t_bd, B, D, p):
    """FFN1 on the (T, B*D) input; output written directly in (B, T, D) layout
    (the (T,B,D)->(B,T,D) transpose is folded into the out_spec).  One merged
    (B*tt, D) matmul per grid step instead of B small ones."""
    T = x_t_bd.shape[0]
    F = p["w1"].shape[1]
    tt = _row_tile(T, max(8, _row_cap(4 * (2 * D + F)) // max(B, 1)))

    def kernel(x_ref, g_ref, b_ref, w1_ref, b1_ref, w2_ref, b2_ref, o_ref):
        x2 = x_ref[...]                                        # (tt, B*D)
        # Batch-major (B*tt, D) slab: rows [bb*tt:(bb+1)*tt] = batch bb's time tile.
        xs = jnp.concatenate([x2[:, bb * D:(bb + 1) * D] for bb in range(B)], axis=0)
        y = _ffn_rows(xs, g_ref[...], b_ref[...], w1_ref[...], b1_ref[...],
                      w2_ref[...], b2_ref[...])
        for bb in range(B):                                    # per-batch sublane store
            o_ref[bb] = y[bb * tt:(bb + 1) * tt].astype(o_ref.dtype)

    args = [x_t_bd, p["ln_g"], p["ln_b"], p["w1"], p["b1"], p["w2"], p["b2"]]
    return pl.pallas_call(
        kernel,
        out_shape=jax.ShapeDtypeStruct((B, T, D), x_t_bd.dtype),
        grid=(T // tt,),
        in_specs=[pl.BlockSpec((tt, B * D), lambda t: (t, 0))]
                 + [_const_spec(a) for a in args[1:]],
        out_specs=pl.BlockSpec((B, tt, D), lambda t: (0, t, 0)),
        compiler_params=_cparams("parallel"),
    )(*args)


def ffn2_block(x_btd, p, final_g, final_b):
    """FFN2 + final LayerNorm, reading (B, T, D) and writing (T, B*D) == (T, B, D)
    directly (transpose folded).  Merged (B*tt, D) matmul; per-batch lane-slice stores."""
    B, T, D = x_btd.shape
    F = p["w1"].shape[1]
    tt = _row_tile(T, max(8, _row_cap(4 * (2 * D + F)) // max(B, 1)))

    def kernel(x_ref, g_ref, b_ref, w1_ref, b1_ref, w2_ref, b2_ref,
               fg_ref, fb_ref, o_ref):
        xs = x_ref[...].reshape(B * tt, D)                     # free leading-dim merge
        y = _ffn_rows(xs, g_ref[...], b_ref[...], w1_ref[...], b1_ref[...],
                      w2_ref[...], b2_ref[...])
        yn = _layer_norm(y, fg_ref[...], fb_ref[...])
        for bb in range(B):                                    # lane-dense slice stores
            o_ref[:, bb * D:(bb + 1) * D] = yn[bb * tt:(bb + 1) * tt].astype(o_ref.dtype)

    args = [x_btd, p["ln_g"], p["ln_b"], p["w1"], p["b1"], p["w2"], p["b2"],
            final_g, final_b]
    out = pl.pallas_call(
        kernel,
        out_shape=jax.ShapeDtypeStruct((T, B * D), x_btd.dtype),
        grid=(T // tt,),
        in_specs=[pl.BlockSpec((B, tt, D), lambda t: (0, t, 0))]
                 + [_const_spec(a) for a in args[1:]],
        out_specs=pl.BlockSpec((tt, B * D), lambda t: (t, 0)),
        compiler_params=_cparams("parallel"),
    )(*args)
    return out.reshape(T, B, D)


# ------------------------------ Attention block -------------------------------

def attn_qkv_block(x_btd, p):
    """Pre-LN + fused QKV projection: one (rows, D) @ (D, 3D) matmul per row tile.
    Outputs q (B,T,D) and kv (B,T,2D) in MXU_DTYPE (halves HBM traffic into flash)."""
    B, T, D = x_btd.shape
    N = B * T
    x_nd = x_btd.reshape(N, D)
    rt = _row_tile(N, _row_cap(4 * 4 * D))

    def kernel(x_ref, g_ref, b_ref, w_ref, bqkv_ref, q_ref, kv_ref):
        xn = _mxu(_layer_norm(x_ref[...], g_ref[...], b_ref[...]))
        y = jnp.dot(xn, w_ref[...], preferred_element_type=jnp.float32) + bqkv_ref[...]
        q_ref[...] = y[:, :D].astype(q_ref.dtype)
        kv_ref[...] = y[:, D:].astype(kv_ref.dtype)

    args = [x_nd, p["ln_g"], p["ln_b"], p["w_qkv"], p["b_qkv"]]
    q, kv = pl.pallas_call(
        kernel,
        out_shape=(jax.ShapeDtypeStruct((N, D), MXU_DTYPE),
                   jax.ShapeDtypeStruct((N, 2 * D), MXU_DTYPE)),
        grid=(N // rt,),
        in_specs=[pl.BlockSpec((rt, D), lambda i: (i, 0))]
                 + [_const_spec(a) for a in args[1:]],
        out_specs=(pl.BlockSpec((rt, D), lambda i: (i, 0)),
                   pl.BlockSpec((rt, 2 * D), lambda i: (i, 0))),
        compiler_params=_cparams("parallel"),
    )(*args)
    return q.reshape(B, T, D), kv.reshape(B, T, 2 * D)


def attn_flash_block(q, kv, mask_add, x_btd, p):
    """Flash-style attention over (batch, query-tile, kv-tile) grid with online softmax
    in VMEM scratch; output projection (single (D,D) matmul) + residual fused into the
    finalize step.  Score tiles are bounded to (tq, tk).  Note: D and hd multiples of
    128 at production shapes keep the per-head lane slices free static views."""
    B, T, D = x_btd.shape
    H = p["num_heads"]
    hd = D // H
    scale = 1.0 / math.sqrt(hd)
    tq = _row_tile(T, 256)
    tk = _kv_tile(T, 512)
    nq, nk = T // tq, T // tk

    def kernel(q_ref, kv_ref, m_ref, x_ref, wo_ref, bo_ref, o_ref,
               m_sc, l_sc, acc_sc):
        ki = pl.program_id(2)

        @pl.when(ki == 0)
        def _():
            m_sc[...] = jnp.full(m_sc.shape, -jnp.inf, m_sc.dtype)
            l_sc[...] = jnp.zeros(l_sc.shape, l_sc.dtype)
            acc_sc[...] = jnp.zeros(acc_sc.shape, acc_sc.dtype)

        qb = q_ref[0]                                          # (tq, D)
        kvb = kv_ref[0]                                        # (tk, 2D)
        kb = kvb[:, :D]
        vb = kvb[:, D:]
        madd = m_ref[0]                                        # (1, tk) additive mask

        # Static per-head loop over the (tq, tk) score tile; running state lives in the
        # VMEM scratch refs, so per-head live ranges stay bounded.
        # TODO(synk): for large H, batch heads with 3-D einsums over (H, tq, hd) slabs.
        for h in range(H):
            qh = qb[:, h * hd:(h + 1) * hd]
            kh = kb[:, h * hd:(h + 1) * hd]
            vh = vb[:, h * hd:(h + 1) * hd]
            s = jax.lax.dot_general(qh, kh, (((1,), (1,)), ((), ())),
                                    preferred_element_type=jnp.float32) * scale + madd
            m_prev = m_sc[:, h:h + 1]
            m_new = jnp.maximum(m_prev, s.max(axis=-1, keepdims=True))
            alpha = jnp.exp(m_prev - m_new)
            pw = jnp.exp(s - m_new)
            l_sc[:, h:h + 1] = alpha * l_sc[:, h:h + 1] + pw.sum(axis=-1, keepdims=True)
            acc_sc[:, h * hd:(h + 1) * hd] = (
                alpha * acc_sc[:, h * hd:(h + 1) * hd]
                + jnp.dot(pw.astype(MXU_DTYPE), vh, preferred_element_type=jnp.float32))
            m_sc[:, h:h + 1] = m_new

        @pl.when(ki == pl.num_programs(2) - 1)
        def _():
            ctx = jnp.concatenate(
                [acc_sc[:, h * hd:(h + 1) * hd]
                 * pl.reciprocal(l_sc[:, h:h + 1], approx=True) for h in range(H)],
                axis=-1)                                       # (tq, D)
            out = (jnp.dot(_mxu(ctx), wo_ref[...], preferred_element_type=jnp.float32)
                   + bo_ref[...] + x_ref[0])
            o_ref[0] = out.astype(o_ref.dtype)

    wparams = [p["wo"], p["bo"]]
    return pl.pallas_call(
        kernel,
        out_shape=jax.ShapeDtypeStruct((B, T, D), x_btd.dtype),
        grid=(B, nq, nk),
        in_specs=[pl.BlockSpec((1, tq, D), lambda b, qi, ki: (b, qi, 0)),
                  pl.BlockSpec((1, tk, 2 * D), lambda b, qi, ki: (b, ki, 0)),
                  pl.BlockSpec((1, 1, tk), lambda b, qi, ki: (b, 0, ki)),
                  pl.BlockSpec((1, tq, D), lambda b, qi, ki: (b, qi, 0))]
                 + [_const_spec(a) for a in wparams],
        out_specs=pl.BlockSpec((1, tq, D), lambda b, qi, ki: (b, qi, 0)),
        scratch_shapes=[pltpu.VMEM((tq, H), jnp.float32),
                        pltpu.VMEM((tq, H), jnp.float32),
                        pltpu.VMEM((tq, D), jnp.float32)],
        compiler_params=_cparams("parallel", "parallel", "arbitrary"),
    )(q, kv, mask_add, x_btd, *wparams)


# ----------------------------- Convolution block ------------------------------

def conv_block(x_btd, p):
    """Conformer convolution module + residual, in two gridded passes.
    Pass 1 (grid over batches, 'arbitrary'): LN -> pw1 -> GLU -> depthwise conv per
    sequence (K taps via pltpu.roll with hoisted (T,1) edge masks), writing the conv
    output and accumulating per-channel sum/sumsq for BatchNorm (training-mode batch
    stats over all B*T rows, biased variance, padded time steps included — matches the
    torch module).  Pass 2 (row-tiled, 'parallel'): BN -> SiLU -> pw2 -> residual.
    TODO(synk): at very long T, further tile pass 1 over time with a (K-1)-row halo."""
    B, T, D = x_btd.shape
    K = p["w_dw"].shape[0]
    pad = (K - 1) // 2
    N = B * T

    def pass1(x_ref, lng, lnb, wpw1, bpw1, wdw, bdw, c_ref, st_ref):
        b = pl.program_id(0)

        @pl.when(b == 0)
        def _():
            st_ref[...] = jnp.zeros(st_ref.shape, st_ref.dtype)

        x = x_ref[0]                                           # (T, D)
        xn = _layer_norm(x, lng[...], lnb[...])
        y = jnp.dot(_mxu(xn), wpw1[...],
                    preferred_element_type=jnp.float32) + bpw1[...]        # (T, 2D)
        u = y[:, :D] * jax.nn.sigmoid(y[:, D:])                # GLU over channels
        t_col = jax.lax.broadcasted_iota(jnp.int32, (T, 1), 0)  # hoisted time index
        w = wdw[...]                                           # (K, D)
        acc = jnp.zeros((T, D), jnp.float32) + bdw[...]
        for j in range(K):
            off = j - pad                                      # tap offset in time
            if off == 0:
                acc = acc + u * w[j:j + 1, :]
            else:
                shifted = pltpu.roll(u, shift=(-off) % T, axis=0)   # row t <- u[t+off]
                valid = jnp.logical_and(t_col + off >= 0, t_col + off < T)
                acc = acc + jnp.where(valid, shifted, 0.0) * w[j:j + 1, :]
        c_ref[0] = acc
        st_ref[...] += jnp.concatenate(
            [jnp.sum(acc, axis=0, keepdims=True),
             jnp.sum(acc * acc, axis=0, keepdims=True)], axis=0)

    a1 = [x_btd, p["ln_g"], p["ln_b"], p["w_pw1"], p["b_pw1"], p["w_dw"], p["b_dw"]]
    c, stats = pl.pallas_call(
        pass1,
        out_shape=(jax.ShapeDtypeStruct((B, T, D), jnp.float32),
                   jax.ShapeDtypeStruct((2, D), jnp.float32)),
        grid=(B,),
        in_specs=[pl.BlockSpec((1, T, D), lambda b: (b, 0, 0))]
                 + [_const_spec(a) for a in a1[1:]],
        out_specs=(pl.BlockSpec((1, T, D), lambda b: (b, 0, 0)),
                   pl.BlockSpec((2, D), lambda b: (0, 0))),
        compiler_params=_cparams("arbitrary"),
    )(*a1)

    rt = _row_tile(N, _row_cap(4 * 4 * D))
    inv_n = 1.0 / float(N)

    def pass2(c_ref, x_ref, st_ref, bng, bnb, wpw2, bpw2, o_ref):
        st = st_ref[...]
        mean = st[0:1, :] * inv_n
        var = jnp.maximum(st[1:2, :] * inv_n - mean * mean, 0.0)   # biased variance
        cb = c_ref[...]
        bn = (cb - mean) * jax.lax.rsqrt(var + BN_EPS) * bng[...] + bnb[...]
        h = _silu(bn)
        z = jnp.dot(_mxu(h), wpw2[...], preferred_element_type=jnp.float32) + bpw2[...]
        o_ref[...] = (z + x_ref[...]).astype(o_ref.dtype)

    a2 = [c.reshape(N, D), x_btd.reshape(N, D), stats, p["bn_g"], p["bn_b"],
          p["w_pw2"], p["b_pw2"]]
    out = pl.pallas_call(
        pass2,
        out_shape=jax.ShapeDtypeStruct((N, D), x_btd.dtype),
        grid=(N // rt,),
        in_specs=[pl.BlockSpec((rt, D), lambda i: (i, 0)),
                  pl.BlockSpec((rt, D), lambda i: (i, 0))]
                 + [_const_spec(a) for a in a2[2:]],
        out_specs=pl.BlockSpec((rt, D), lambda i: (i, 0)),
        compiler_params=_cparams("parallel"),
    )(*a2)
    return out.reshape(B, T, D)


# ------------------------------ Full forward pass -----------------------------

def conformer_layer_forward(x_tbd, key_padding_mask, params):
    """x_tbd: (T, B, D) float32.  key_padding_mask: (B, T) (True/1 = padded key) or None.
    Matches torchaudio ConformerLayer.forward with convolution_first=False."""
    T, B, D = x_tbd.shape

    # FFN1 (+0.5x residual); output emitted directly in (B, T, D) (transpose folded).
    x_btd = ffn1_block(x_tbd.reshape(T, B * D), B, D, params["ffn1"])

    # Self-attention (+ residual): fused QKV projection, then flash attention with the
    # output projection and residual fused into the finalize step.
    q, kv = attn_qkv_block(x_btd, params["attn"])
    if key_padding_mask is None:
        mask_add = jnp.zeros((B, 1, T), jnp.float32)
    else:
        mask_add = jnp.where(key_padding_mask.astype(bool), NEG_INF,
                             0.0).astype(jnp.float32).reshape(B, 1, T)
    x_btd = attn_flash_block(q, kv, mask_add, x_btd, params["attn"])

    # Convolution module (+ residual), two gridded passes.
    x_btd = conv_block(x_btd, params["conv"])

    # FFN2 (+0.5x residual) fused with the final LayerNorm; output written directly in
    # (T, B, D) layout (transpose folded).
    return ffn2_block(x_btd, params["ffn2"],
                      params["final_ln_g"], params["final_ln_b"])


# ----------------------------- parameter creation ------------------------------

def init_params(key, D, F, H, K):
    def nrm(k, shape, scale=0.05):
        return (scale * jax.random.normal(k, shape)).astype(jnp.float32)

    ks = jax.random.split(key, 20)
    ones = lambda s: jnp.ones(s, jnp.float32)
    zeros = lambda s: jnp.zeros(s, jnp.float32)
    mxu = lambda a: a.astype(MXU_DTYPE)                       # honours MXU_DTYPE=f32 too

    def ffn(k0, k1, k2, k3):
        return dict(ln_g=ones((1, D)), ln_b=zeros((1, D)),
                    w1=mxu(nrm(ks[k0], (D, F))), b1=nrm(ks[k1], (1, F)),
                    w2=mxu(nrm(ks[k2], (F, D))), b2=nrm(ks[k3], (1, D)))

    # Fused QKV weight in x @ W layout: lanes [:D]=Q, [D:2D]=K, [2D:]=V
    # (equivalent to torch's in_proj (3D, D) transposed); out_proj (D, D).
    attn = dict(num_heads=H, ln_g=ones((1, D)), ln_b=zeros((1, D)),
                w_qkv=mxu(nrm(ks[8], (D, 3 * D))), b_qkv=nrm(ks[9], (1, 3 * D)),
                wo=mxu(nrm(ks[10], (D, D))), bo=nrm(ks[11], (1, D)))

    conv = dict(ln_g=ones((1, D)), ln_b=zeros((1, D)),
                w_pw1=mxu(nrm(ks[12], (D, 2 * D))), b_pw1=nrm(ks[13], (1, 2 * D)),
                w_dw=nrm(ks[14], (K, D)), b_dw=nrm(ks[15], (1, D)),
                bn_g=ones((1, D)), bn_b=zeros((1, D)),
                w_pw2=mxu(nrm(ks[16], (D, D))), b_pw2=nrm(ks[17], (1, D)))
    return dict(ffn1=ffn(0, 1, 2, 3), ffn2=ffn(4, 5, 6, 7), attn=attn, conv=conv,
                final_ln_g=ones((1, D)), final_ln_b=zeros((1, D)))


if __name__ == "__main__":
    # input_dim=32, ffn_dim=64, heads=4, depthwise kernel=3; seq=16, batch=2.
    T, B, D, F, H, K = 16, 2, 32, 64, 4, 3
    key = jax.random.PRNGKey(0)
    kx, kp = jax.random.split(key)
    x = jax.random.normal(kx, (T, B, D), jnp.float32)
    params = init_params(kp, D, F, H, K)

    # No key padding mask.
    out = conformer_layer_forward(x, None, params)
    out = jax.block_until_ready(out)
    assert out.shape == (T, B, D) and out.dtype == jnp.float32
    assert bool(jnp.all(jnp.isfinite(out)))

    # With a key padding mask (last 3 keys of batch 1 padded) — exercises the finite
    # (-1e9) masking path through the online softmax; must stay NaN-free.
    kpm = jnp.zeros((B, T), bool).at[1, -3:].set(True)
    out_m = conformer_layer_forward(x, kpm, params)
    out_m = jax.block_until_ready(out_m)
    assert out_m.shape == (T, B, D)
    assert bool(jnp.all(jnp.isfinite(out_m)))

    print("KERNEL_OK")
</pallas_src>

<mosaic_0001>
module attributes {stable_mosaic.version = 11 : i64} {
  func.func @kernel(%arg0: i32, %arg1: memref<16x64xf32, #tpu.memory_space<vmem>>, %arg2: memref<1x32xf32, #tpu.memory_space<vmem>>, %arg3: memref<1x32xf32, #tpu.memory_space<vmem>>, %arg4: memref<32x64xbf16, #tpu.memory_space<vmem>>, %arg5: memref<1x64xf32, #tpu.memory_space<vmem>>, %arg6: memref<64x32xbf16, #tpu.memory_space<vmem>>, %arg7: memref<1x32xf32, #tpu.memory_space<vmem>>, %arg8: memref<2x16x32xf32, #tpu.memory_space<vmem>>) attributes {dimension_semantics = [#tpu.dimension_semantics<parallel>], iteration_bounds = array<i64: 1>, scalar_prefetch = 0 : i64, scratch_operands = 0 : i64, tpu.core_type = #tpu.core_type<tc>, window_params = [{transform_indices = @transform_0, window_bounds = array<i64: 16, 64>}, {pipeline_mode = #tpu.pipeline_mode<synchronous>, transform_indices = @transform_1, window_bounds = array<i64: 1, 32>}, {pipeline_mode = #tpu.pipeline_mode<synchronous>, transform_indices = @transform_2, window_bounds = array<i64: 1, 32>}, {pipeline_mode = #tpu.pipeline_mode<synchronous>, transform_indices = @transform_3, window_bounds = array<i64: 32, 64>}, {pipeline_mode = #tpu.pipeline_mode<synchronous>, transform_indices = @transform_4, window_bounds = array<i64: 1, 64>}, {pipeline_mode = #tpu.pipeline_mode<synchronous>, transform_indices = @transform_5, window_bounds = array<i64: 64, 32>}, {pipeline_mode = #tpu.pipeline_mode<synchronous>, transform_indices = @transform_6, window_bounds = array<i64: 1, 32>}, {transform_indices = @transform_7, window_bounds = array<i64: 2, 16, 32>}]} {
    %c0 = arith.constant 0 : index
    %c0_0 = arith.constant 0 : index
    %0 = vector.load %arg1[%c0, %c0_0] : memref<16x64xf32, #tpu.memory_space<vmem>>, vector<16x64xf32>
    %1 = vector.extract_strided_slice %0 {offsets = [0, 0], sizes = [16, 32], strides = [1, 1]} : vector<16x64xf32> to vector<16x32xf32>
    %2 = vector.extract_strided_slice %0 {offsets = [0, 32], sizes = [16, 32], strides = [1, 1]} : vector<16x64xf32> to vector<16x32xf32>
    %3 = tpu.concatenate %1, %2 in 0 : vector<16x32xf32>, vector<16x32xf32> -> vector<32x32xf32>
    %c0_1 = arith.constant 0 : index
    %c0_2 = arith.constant 0 : index
    %4 = vector.load %arg2[%c0_1, %c0_2] : memref<1x32xf32, #tpu.memory_space<vmem>>, vector<1x32xf32>
    %c0_3 = arith.constant 0 : index
    %c0_4 = arith.constant 0 : index
    %5 = vector.load %arg3[%c0_3, %c0_4] : memref<1x32xf32, #tpu.memory_space<vmem>>, vector<1x32xf32>
    %c0_5 = arith.constant 0 : index
    %c0_6 = arith.constant 0 : index
    %6 = vector.load %arg4[%c0_5, %c0_6] : memref<32x64xbf16, #tpu.memory_space<vmem>>, vector<32x64xbf16>
    %c0_7 = arith.constant 0 : index
    %c0_8 = arith.constant 0 : index
    %7 = vector.load %arg5[%c0_7, %c0_8] : memref<1x64xf32, #tpu.memory_space<vmem>>, vector<1x64xf32>
    %c0_9 = arith.constant 0 : index
    %c0_10 = arith.constant 0 : index
    %8 = vector.load %arg6[%c0_9, %c0_10] : memref<64x32xbf16, #tpu.memory_space<vmem>>, vector<64x32xbf16>
    %c0_11 = arith.constant 0 : index
    %c0_12 = arith.constant 0 : index
    %9 = vector.load %arg7[%c0_11, %c0_12] : memref<1x32xf32, #tpu.memory_space<vmem>>, vector<1x32xf32>
    %cst = arith.constant dense<0.000000e+00> : vector<32xf32>
    %10 = vector.multi_reduction <add>, %3, %cst [1] : vector<32x32xf32> to vector<32xf32>
    %11 = vector.shape_cast %10 : vector<32xf32> to vector<32x1xf32>
    %cst_13 = arith.constant 3.200000e+01 : f32
    %12 = vector.broadcast %cst_13 : f32 to vector<32x1xf32>
    %13 = arith.divf %11, %12 : vector<32x1xf32>
    %14 = vector.broadcast %13 : vector<32x1xf32> to vector<32x32xf32>
    %15 = arith.subf %3, %14 : vector<32x32xf32>
    %16 = arith.mulf %15, %15 : vector<32x32xf32>
    %cst_14 = arith.constant dense<0.000000e+00> : vector<32xf32>
    %17 = vector.multi_reduction <add>, %16, %cst_14 [1] : vector<32x32xf32> to vector<32xf32>
    %18 = vector.shape_cast %17 : vector<32xf32> to vector<32x1xf32>
    %cst_15 = arith.constant 3.200000e+01 : f32
    %19 = vector.broadcast %cst_15 : f32 to vector<32x1xf32>
    %20 = arith.divf %18, %19 : vector<32x1xf32>
    %21 = vector.broadcast %13 : vector<32x1xf32> to vector<32x32xf32>
    %22 = arith.subf %3, %21 : vector<32x32xf32>
    %cst_16 = arith.constant 9.99999974E-6 : f32
    %23 = vector.broadcast %cst_16 : f32 to vector<32x1xf32>
    %24 = arith.addf %20, %23 : vector<32x1xf32>
    %25 = math.rsqrt %24 : vector<32x1xf32>
    %26 = vector.broadcast %25 : vector<32x1xf32> to vector<32x32xf32>
    %27 = arith.mulf %22, %26 : vector<32x32xf32>
    %28 = vector.broadcast %4 : vector<1x32xf32> to vector<32x32xf32>
    %29 = arith.mulf %27, %28 : vector<32x32xf32>
    %30 = vector.broadcast %5 : vector<1x32xf32> to vector<32x32xf32>
    %31 = arith.addf %29, %30 : vector<32x32xf32>
    %32 = arith.truncf %31 : vector<32x32xf32> to vector<32x32xbf16>
    %cst_17 = arith.constant dense<0.000000e+00> : vector<32x64xf32>
    %33 = tpu.matmul %32, %6, %cst_17 {dimension_numbers = #tpu.dot_dimension_numbers<[1], [0], [0], [1], [0, 0, 1, 1], [], []>} : vector<32x32xbf16>, vector<32x64xbf16>, vector<32x64xf32> -> vector<32x64xf32>
    %34 = vector.broadcast %7 : vector<1x64xf32> to vector<32x64xf32>
    %35 = arith.addf %33, %34 : vector<32x64xf32>
    %36 = arith.negf %35 : vector<32x64xf32>
    %37 = math.exp %36 : vector<32x64xf32>
    %cst_18 = arith.constant 1.000000e+00 : f32
    %38 = vector.broadcast %cst_18 : f32 to vector<32x64xf32>
    %39 = arith.addf %38, %37 : vector<32x64xf32>
    %40 = arith.divf %38, %39 : vector<32x64xf32>
    %41 = arith.mulf %35, %40 : vector<32x64xf32>
    %42 = arith.truncf %41 : vector<32x64xf32> to vector<32x64xbf16>
    %cst_19 = arith.constant dense<0.000000e+00> : vector<32x32xf32>
    %43 = tpu.matmul %42, %8, %cst_19 {dimension_numbers = #tpu.dot_dimension_numbers<[1], [0], [0], [1], [0, 0, 1, 1], [], []>} : vector<32x64xbf16>, vector<64x32xbf16>, vector<32x32xf32> -> vector<32x32xf32>
    %44 = vector.broadcast %9 : vector<1x32xf32> to vector<32x32xf32>
    %45 = arith.addf %43, %44 : vector<32x32xf32>
    %cst_20 = arith.constant 5.000000e-01 : f32
    %46 = vector.broadcast %cst_20 : f32 to vector<32x32xf32>
    %47 = arith.mulf %45, %46 : vector<32x32xf32>
    %48 = arith.addf %47, %3 : vector<32x32xf32>
    %49 = vector.extract_strided_slice %48 {offsets = [0, 0], sizes = [16, 32], strides = [1, 1]} : vector<32x32xf32> to vector<16x32xf32>
    %c0_21 = arith.constant 0 : index
    %c0_22 = arith.constant 0 : index
    %c0_23 = arith.constant 0 : index
    %50 = vector.load %arg8[%c0_21, %c0_22, %c0_23] : memref<2x16x32xf32, #tpu.memory_space<vmem>>, vector<1x16x32xf32>
    %51 = vector.shape_cast %50 : vector<1x16x32xf32> to vector<16x32xf32>
    %52 = vector.shape_cast %49 : vector<16x32xf32> to vector<1x16x32xf32>
    tpu.vector_store %arg8[%c0_21, %c0_22, %c0_23], %52 {strides = array<i32>} : memref<2x16x32xf32, #tpu.memory_space<vmem>>, vector<1x16x32xf32>,
    %53 = vector.extract_strided_slice %48 {offsets = [16, 0], sizes = [16, 32], strides = [1, 1]} : vector<32x32xf32> to vector<16x32xf32>
    %c1 = arith.constant 1 : index
    %c0_24 = arith.constant 0 : index
    %c0_25 = arith.constant 0 : index
    %54 = vector.load %arg8[%c1, %c0_24, %c0_25] : memref<2x16x32xf32, #tpu.memory_space<vmem>>, vector<1x16x32xf32>
    %55 = vector.shape_cast %54 : vector<1x16x32xf32> to vector<16x32xf32>
    %56 = vector.shape_cast %53 : vector<16x32xf32> to vector<1x16x32xf32>
    tpu.vector_store %arg8[%c1, %c0_24, %c0_25], %56 {strides = array<i32>} : memref<2x16x32xf32, #tpu.memory_space<vmem>>, vector<1x16x32xf32>,
    return
  }
  func.func @transform_0(%arg0: i32) -> (i32, i32) {
    %c0_i32 = arith.constant 0 : i32
    %c0_i32_0 = arith.constant 0 : i32
    return %arg0, %c0_i32 : i32, i32
  }
  func.func @transform_1(%arg0: i32) -> (i32, i32) {
    %c0_i32 = arith.constant 0 : i32
    %c0_i32_0 = arith.constant 0 : i32
    %c0_i32_1 = arith.constant 0 : i32
    return %c0_i32, %c0_i32_0 : i32, i32
  }
  func.func @transform_2(%arg0: i32) -> (i32, i32) {
    %c0_i32 = arith.constant 0 : i32
    %c0_i32_0 = arith.constant 0 : i32
    %c0_i32_1 = arith.constant 0 : i32
    return %c0_i32, %c0_i32_0 : i32, i32
  }
  func.func @transform_3(%arg0: i32) -> (i32, i32) {
    %c0_i32 = arith.constant 0 : i32
    %c0_i32_0 = arith.constant 0 : i32
    %c0_i32_1 = arith.constant 0 : i32
    return %c0_i32, %c0_i32_0 : i32, i32
  }
  func.func @transform_4(%arg0: i32) -> (i32, i32) {
    %c0_i32 = arith.constant 0 : i32
    %c0_i32_0 = arith.constant 0 : i32
    %c0_i32_1 = arith.constant 0 : i32
    return %c0_i32, %c0_i32_0 : i32, i32
  }
  func.func @transform_5(%arg0: i32) -> (i32, i32) {
    %c0_i32 = arith.constant 0 : i32
    %c0_i32_0 = arith.constant 0 : i32
    %c0_i32_1 = arith.constant 0 : i32
    return %c0_i32, %c0_i32_0 : i32, i32
  }
  func.func @transform_6(%arg0: i32) -> (i32, i32) {
    %c0_i32 = arith.constant 0 : i32
    %c0_i32_0 = arith.constant 0 : i32
    %c0_i32_1 = arith.constant 0 : i32
    return %c0_i32, %c0_i32_0 : i32, i32
  }
  func.func @transform_7(%arg0: i32) -> (i32, i32, i32) {
    %c0_i32 = arith.constant 0 : i32
    %c0_i32_0 = arith.constant 0 : i32
    %c0_i32_1 = arith.constant 0 : i32
    return %c0_i32, %arg0, %c0_i32_0 : i32, i32, i32
  }
}

</mosaic_0001>

<bundles_post_ra>
// kernel: tpu_custom_call.1
= control target key start
LH: loop header
LB: loop body
LE: loop exit
PB: predicated region body
PF: predicated region fallthrough
CT: control target
= control target key end

     0   :  { %vm54_vm0 = vcmask 261120   ;;  %s454_s28 = smov 96   ;;  %s582_s0 = inlined_call_operand.vmem [shape: f32[16,64], index: 0, kind: input, shape index: {}]   ;;  %s583_s1 = inlined_call_operand.vmem [shape: f32[1,32], index: 1, kind: input, shape index: {}]   ;;  %s584_s2 = inlined_call_operand.vmem [shape: f32[1,32], index: 2, kind: input, shape index: {}]   ;;  %s585_s3 = inlined_call_operand.vmem [shape: bf16[32,64], index: 3, kind: input, shape index: {}]   ;;  %s586_s4 = inlined_call_operand.vmem [shape: f32[1,64], index: 4, kind: input, shape index: {}]   ;;  %s587_s5 = inlined_call_operand.vmem [shape: bf16[64,32], index: 5, kind: input, shape index: {}]   ;;  %s588_s6 = inlined_call_operand.vmem [shape: f32[1,32], index: 6, kind: input, shape index: {}]   ;;  %s589_s7 = inlined_call_operand.hbm [shape: f32[2,16,32], index: 7, kind: output, shape index: {}]  }
   0x1   :  { %v501_v0 = vld [vmem:[%s582_s0] sm:$0xff]  ;;  %v506_v1 = vld [vmem:[%s582_s0 + $0x8] sm:$0xff] }
   0x2   :  { %32 = vrot.lane.b32.xlu0 %v501_v0, %s454_s28  ;;  %v55_v2 = vsel %vm54_vm0, %v501_v0, 0.0  ;;  %v58_v3 = vsel %vm54_vm0, %v506_v1, 0.0 }
   0x3   :  { %56 = vadd.xlane.f32.xlu1 %v55_v2 }
   0x6   :  { %34 = vrot.lane.b32.xlu0 %v506_v1, %s454_s28 }
   0x7   :  { %12 = vsyncpa [#allocation3], 0  ;;  %59 = vadd.xlane.f32.xlu1 %v58_v3  ;;  %v400_v33 = vld [vmem:[%s585_s3] sm:$0xff]   ;;  %v401_v35 = vld [vmem:[%s585_s3 + $0x8] sm:$0xff]   ;;  %vm263_vm1 = vcmask 523264   ;;  %s455_s20 = smov [#allocation2]  }
   0x8   :  { %376 = vmatprep.subr.bf16.mxu0 %v400_v33  ;;  %v348_v38 = vld [vmem:[%s583_s1] ss:$0 sm:$0xff]  ;;  %v403_v63 = vld [vmem:[%s587_s5 + $0x8] sm:$0xff]   ;;  %v404_v2 = vld [vmem:[%s587_s5 + $0x10] sm:$0xff]   ;;  %s337_s21 = sshll.u32 %s455_s20, 4  ;;  %s338_s21 = int_to_ptr.vmem [resolvable:$true] %s337_s21 }
   0x9   :  { %377 = vmatpush3.bf16.msra.mxu0 %v400_v33  ;;  %v349_v42 = vld [vmem:[%s584_s2] ss:$0 sm:$0xff]  ;;  %v405_v3 = vld [vmem:[%s587_s5 + $0x18] sm:$0xff]   ;;  %p435_p1 = scmp.lt.s32.totalorder %s338_s21, %s338_s21 }
   0xa   :  { %378 = vmatprep.subr.bf16.mxu0 %v401_v35  ;;  %v402_v62 = vld [vmem:[%s587_s5] sm:$0xff]  }
   0xb   :  { %384 = vmatprep.subr.bf16.mxu1 %v402_v62 }
   0xc   :  { %385 = vmatpush3.bf16.msra.mxu1 %v402_v62 }
   0xd   :  { %379 = vmatpush3.bf16.msra.mxu0 %v401_v35  ;;  %386 = vmatprep.subr.bf16.mxu1 %v403_v63 }
  0x10   :  { %387 = vmatpush3.bf16.msra.mxu1 %v403_v63 }
  0x11   :  { %388 = vmatprep.subr.bf16.mxu1 %v404_v2 }
  0x14   :  { %389 = vmatpush3.bf16.msra.mxu1 %v404_v2 }
  0x15   :  { %390 = vmatprep.subr.bf16.mxu1 %v405_v3 }
  0x18   :  { %391 = vmatpush3.bf16.msra.mxu1 %v405_v3 }
  0x74   :  { %v514_v4 = vpop.permute.xlu0 %32 }
  0x75   :  { %v61_v5 = vsel %vm54_vm0, %v514_v4, 0.0 }
  0x76   :  { %62 = vadd.xlane.f32.xlu0 %v61_v5  ;;  %v350_v5 = vld [vmem:[%s586_s4] ss:$0 sm:$0xff] }
  0x78   :  { %v518_v6 = vpop.permute.xlu0 %34 }
  0x79   :  { %v64_v7 = vsel %vm54_vm0, %v518_v6, 0.0 }
  0x7a   :  { %65 = vadd.xlane.f32.xlu1 %v64_v7 }
  0x90   :  { %v57_v8 = vpop.xlane.xlu1 %56 }
  0x91   :  { %v68_v9 = vmul.f32 0.03125, %v57_v8 }
  0x93   :  { %v72_v10 = vsub.f32 %v501_v0, %v68_v9 }
  0x94   :  { %v60_v11 = vpop.xlane.xlu1 %59 }
  0x95   :  { %v69_v12 = vmul.f32 0.03125, %v60_v11  ;;  %v76_v13 = vmul.f32 %v72_v10, %v72_v10 }
  0x97   :  { %v73_v14 = vsub.f32 %v506_v1, %v69_v12  ;;  %v80_v15 = vsel %vm54_vm0, %v76_v13, 0.0 }
  0x98   :  { %81 = vadd.xlane.f32.xlu1 %v80_v15 }
  0x99   :  { %v77_v16 = vmul.f32 %v73_v14, %v73_v14 }
  0x9b   :  { %v83_v17 = vsel %vm54_vm0, %v77_v16, 0.0 }
  0x9c   :  { %84 = vadd.xlane.f32.xlu1 %v83_v17 }
 0x103   :  { %v63_v18 = vpop.xlane.xlu0 %62 }
 0x104   :  { %v70_v19 = vmul.f32 0.03125, %v63_v18 }
 0x106   :  { %v74_v20 = vsub.f32 %v514_v4, %v70_v19 }
 0x107   :  { %v66_v21 = vpop.xlane.xlu1 %65 }
 0x108   :  { %v71_v22 = vmul.f32 0.03125, %v66_v21  ;;  %v78_v23 = vmul.f32 %v74_v20, %v74_v20 }
 0x10a   :  { %v75_v24 = vsub.f32 %v518_v6, %v71_v22  ;;  %v86_v25 = vsel %vm54_vm0, %v78_v23, 0.0 }
 0x10b   :  { %87 = vadd.xlane.f32.xlu1 %v86_v25 }
 0x10c   :  { %v79_v26 = vmul.f32 %v75_v24, %v75_v24 }
 0x10e   :  { %v89_v27 = vsel %vm54_vm0, %v79_v26, 0.0 }
 0x10f   :  { %90 = vadd.xlane.f32.xlu1 %v89_v27 }
 0x125   :  { %v82_v28 = vpop.xlane.xlu1 %81 }
 0x126   :  { %v92_v29 = vmul.f32 0.03125, %v82_v28 }
 0x128   :  { %v96_v30 = vadd.f32 1e-05, %v92_v29 }
 0x129   :  { %v85_v31 = vpop.xlane.xlu1 %84 }
 0x12a   :  { %406 = vrsqrt.f32 %v96_v30  ;;  %v93_v32 = vmul.f32 0.03125, %v85_v31 }
 0x12c   :  { %v97_v34 = vadd.f32 1e-05, %v93_v32 }
 0x12e   :  { %408 = vrsqrt.f32 %v97_v34 }
 0x134   :  { %v407_v36 = vpop.eup %406 }
 0x135   :  { %v104_v37 = vmul.f32 %v407_v36, %v72_v10 }
 0x137   :  { %v114_v41 = vmul.f32 %v348_v38, %v104_v37  ;;  %v359_v37 = vld [vmem:[%s588_s6] ss:$0 sm:$0xff]  ;;  %s430_s6 = scalar_lea.vmem %s338_s21, 512 }
 0x138   :  { %v409_v39 = vpop.eup %408  ;;  %p431_p0 = scmp.ne.s32.totalorder %s338_s21, %s430_s6  ;;  %p436_p2 = scmp.lt.s32.totalorder %s430_s6, %s430_s6 }
 0x139   :  { %v105_v40 = vmul.f32 %v409_v39, %v73_v14  ;;  %v124_v44 = vadd.f32 %v349_v42, %v114_v41 }
 0x13a   :  { %p437_p3 = por %p436_p2, %p435_p1 }
 0x13b   :  { %v115_v43 = vmul.f32 %v348_v38, %v105_v40 }
 0x13c   :  { %p438_p4 = pnand %p437_p3, %p431_p0 }
 0x13d   :  { %v125_v45 = vadd.f32 %v349_v42, %v115_v43 }
 0x13f   :  { %v128_v46 = vpack.c.bf16 %v125_v45, %v124_v44 }
 0x141   :  { %380 = vmatprep.mubr.msk.bf16.mxu0 %vm54_vm0, %v128_v46 }
 0x198   :  { %v88_v47 = vpop.xlane.xlu1 %87 }
 0x199   :  { %v94_v48 = vmul.f32 0.03125, %v88_v47 }
 0x19b   :  { %v98_v49 = vadd.f32 1e-05, %v94_v48 }
 0x19c   :  { %v91_v50 = vpop.xlane.xlu1 %90 }
 0x19d   :  { %410 = vrsqrt.f32 %v98_v49  ;;  %v95_v51 = vmul.f32 0.03125, %v91_v50 }
 0x19f   :  { %v99_v52 = vadd.f32 1e-05, %v95_v51 }
 0x1a1   :  { %412 = vrsqrt.f32 %v99_v52 }
 0x1a7   :  { %v411_v53 = vpop.eup %410 }
 0x1a8   :  { %v106_v54 = vmul.f32 %v411_v53, %v74_v20 }
 0x1aa   :  { %v116_v57 = vmul.f32 %v348_v38, %v106_v54 }
 0x1ab   :  { %v413_v55 = vpop.eup %412 }
 0x1ac   :  { %v107_v56 = vmul.f32 %v413_v55, %v75_v24  ;;  %v126_v59 = vadd.f32 %v349_v42, %v116_v57 }
 0x1ae   :  { %v117_v58 = vmul.f32 %v348_v38, %v107_v56 }
 0x1b0   :  { %v127_v60 = vadd.f32 %v349_v42, %v117_v58 }
 0x1b2   :  { %v129_v61 = vpack.c.bf16 %v127_v60, %v126_v59 }
 0x1b4   :  { %381 = vmatmul.mubr.msk.bf16.vlgmr.msra.gmra.mrb[0].mxu0 %vm54_vm0, %v129_v61 }
 0x287   :  { %v382_v7 = vpop.f32.mrb[0].mxu0 }
 0x288   :  { %v197_v8 = vadd.f32 %v382_v7, %v350_v5  ;;  %v188_v9 = vpop.f32.mrb[1].mxu0 }
 0x289   :  { %v189_v10 = vadd.f32 %v350_v5, %v188_v9  ;;  %v383_v11 = vpop.f32.mrb[2].mxu0 }
 0x28a   :  { %v357_v12 = vmul.f32 -1.442695, %v197_v8  ;;  %v200_v13 = vadd.f32 %v383_v11, %v350_v5  ;;  %v191_v14 = vpop.f32.mrb[3].mxu0 }
 0x28b   :  { %v355_v15 = vmul.f32 -1.442695, %v189_v10  ;;  %v192_v16 = vadd.f32 %v350_v5, %v191_v14 }
 0x28c   :  { %414 = vpow2.f32 %v357_v12  ;;  %v358_v17 = vmul.f32 -1.442695, %v200_v13 }
 0x28d   :  { %416 = vpow2.f32 %v355_v15  ;;  %v356_v18 = vmul.f32 -1.442695, %v192_v16 }
 0x28e   :  { %418 = vpow2.f32 %v358_v17 }
 0x28f   :  { %420 = vpow2.f32 %v356_v18 }
 0x296   :  { %v415_v19 = vpop.eup %414 }
 0x297   :  { %v417_v20 = vpop.eup %416  ;;  %v217_v21 = vadd.f32 1.0, %v415_v19 }
 0x298   :  { %v419_v22 = vpop.eup %418  ;;  %v215_v23 = vadd.f32 1.0, %v417_v20 }
 0x299   :  { %v421_v24 = vpop.eup %420  ;;  %422 = vrcp.f32 %v217_v21  ;;  %v218_v25 = vadd.f32 1.0, %v419_v22 }
 0x29a   :  { %424 = vrcp.f32 %v215_v23  ;;  %v216_v26 = vadd.f32 1.0, %v421_v24 }
 0x29b   :  { %426 = vrcp.f32 %v218_v25 }
 0x29c   :  { %428 = vrcp.f32 %v216_v26 }
 0x2a3   :  { %v423_v27 = vpop.eup %422 }
 0x2a4   :  { %v425_v28 = vpop.eup %424  ;;  %v229_v31 = vmul.f32 %v423_v27, %v197_v8 }
 0x2a5   :  { %v427_v29 = vpop.eup %426  ;;  %v227_v33 = vmul.f32 %v425_v28, %v189_v10 }
 0x2a6   :  { %v429_v30 = vpop.eup %428  ;;  %v230_v32 = vmul.f32 %v427_v29, %v200_v13 }
 0x2a7   :  { %v228_v34 = vmul.f32 %v429_v30, %v192_v16 }
 0x2a8   :  { %v232_v35 = vpack.c.bf16 %v230_v32, %v229_v31 }
 0x2a9   :  { %v231_v36 = vpack.c.bf16 %v228_v34, %v227_v33 }
 0x2ab   :  { %392 = vmatprep.mubr.msk.bf16.mxu1 %vm263_vm1, %v231_v36 }
 0x2ac   :  { %393 = vmatmul.mubr.msk.bf16.vlgmr.msra.gmra.mrb[0].mxu1 %vm263_vm1, %v232_v35 }
 0x37f   :  { %v394_v38 = vpop.f32.mrb[0].mxu1 }
 0x380   :  { %v313_v39 = vadd.f32 %v394_v38, %v359_v37  ;;  %v304_v40 = vpop.f32.mrb[1].mxu1 }
 0x381   :  { %v305_v41 = vadd.f32 %v359_v37, %v304_v40  ;;  %v395_v42 = vpop.f32.mrb[2].mxu1 }
 0x382   :  { %v321_v43 = vmul.f32 0.5, %v313_v39  ;;  %v316_v44 = vadd.f32 %v395_v42, %v359_v37  ;;  %v307_v45 = vpop.f32.mrb[3].mxu1 }
 0x383   :  { %v319_v46 = vmul.f32 0.5, %v305_v41  ;;  %v308_v47 = vadd.f32 %v359_v37, %v307_v45 }
 0x384   :  { %v325_v48 = vadd.f32 %v321_v43, %v514_v4  ;;  %v322_v49 = vmul.f32 0.5, %v316_v44 }
 0x385   :  { %v323_v50 = vadd.f32 %v319_v46, %v501_v0  ;;  %v320_v51 = vmul.f32 0.5, %v308_v47 }
 0x386   :  { %330 = vst.msk [vmem:[#allocation2 + $0x10] sm:$0xff] %vm54_vm0, %v325_v48  ;;  %v326_v52 = vadd.f32 %v322_v49, %v518_v6 }
 0x387   :  { %327 = vst.msk [vmem:[#allocation2] sm:$0xff] %vm54_vm0, %v323_v50  ;;  %v324_v53 = vadd.f32 %v320_v51, %v506_v1 }
 0x388   :  { %331 = vst.msk [vmem:[#allocation2 + $0x18] sm:$0xff] %vm54_vm0, %v326_v52 }
 0x389   :  { %328 = vst.msk [vmem:[#allocation2 + $0x8] sm:$0xff] %vm54_vm0, %v324_v53 }
 0x38a   :  { %441 = shalt.err (!%p438_p4)
}
 0x38b   :  { %s442_s24 = scalar_lea.hbm %s589_s7, 512 }
 0x38c   :  { %p443_p5 = scmp.ne.s32.totalorder %s589_s7, %s442_s24  ;;  %p446_p6 = scmp.lt.u32.totalorder %s442_s24, %s589_s7 }
 0x38e   :  { %p448_p7 = pnand %p446_p6, %p443_p5 }
 0x390   :  { %451 = shalt.err (!%p448_p7)
}
 0x391   :  { %s456_s0 = smov 128   ;;  %s457_s29 = smov 8  }
 0x392   :  { %343 = dma.vmem_to_hbm [thread:$0]  %s338_s21, 512, %s589_s7, [#allocation3], %s456_s0, %s456_s0, %s457_s29  }
 0x393   :  { %452 = dma.done.wait [#allocation3], 512  }
 0x394   :  { %453 = vsyncadd [#allocation3], 4294966784 }
 0x395   :  { %347 = vsyncpa [#allocation3], 1 }

</bundles_post_ra>
